<compile_context>
chip_gen: v7x
topology: tpu7x:2x2x1
jax: 0.10.0
libtpu: 0.0.40
codegen_flags: <defaults>
</compile_context>

<pallas_src>
from functools import partial

import jax
import jax.numpy as jnp
from jax.experimental import pallas as pl
from jax.experimental.pallas import tpu as pltpu

factors = [1, 1, 1, 1, 1 / 2, 1 / 4, 1 / 8, 1 / 16, 1 / 32]

_EPS = 1e-8
_LEAK = 0.2
_LANE = 128
_VMEM_BUDGET = 20 * 1024 * 1024      # in-flight working set; safe on v7x 64 MiB


def _pad_lanes(c):
    return ((c + _LANE - 1) // _LANE) * _LANE


def _vmem_limit(need_bytes):
    return int(min(max(need_bytes + (8 << 20), 16 << 20), 112 << 20))


def _pick_tm(m, row_bytes):
    """Largest row tile (multiple of 8, or full M) whose double-buffered
    in+out blocks stay under the VMEM budget."""
    if m <= 8:
        return m
    tm = min(m, 2048)
    tm -= tm % 8
    while tm > 8 and 2 * tm * row_bytes > _VMEM_BUDGET:
        tm //= 2
    return tm if tm < m else m


# ---------------------------------------------------------------------------
# Pallas kernels
# ---------------------------------------------------------------------------
def _gemm_kernel(x_ref, w_ref, b_ref, o_ref, *, input_pn, pn_dim, leaky):
    """(opt. PixelNorm over true dims) -> bf16 matmul (f32 acc) -> +bias
       -> (opt. LeakyReLU).  x:(TM,K) w:(K,Co) b:(1,Co) o:(TM,Co)."""
    x = x_ref[...]
    if input_pn:
        xf = x.astype(jnp.float32)
        xf = xf * jax.lax.rsqrt(
            jnp.sum(xf * xf, axis=-1, keepdims=True) * (1.0 / pn_dim) + _EPS)
        x = xf
    y = jnp.dot(x.astype(jnp.bfloat16), w_ref[...],
                preferred_element_type=jnp.float32)
    y = y + b_ref[...]
    if leaky:
        y = jnp.maximum(y, _LEAK * y)
    o_ref[...] = y.astype(o_ref.dtype)


def _conv3x3_kernel(x_hbm, w_ref, b_ref, o_ref, xbuf, acc_ref, sem,
                    *, th, wp, n_copy, true_cout):
    """Direct 3x3 conv + LeakyReLU + PixelNorm on a halo'd row tile.

    x_hbm : (N, (H+2)*WP, Cin_p)  HBM, zero-padded borders, bf16 (flattened)
    w_ref : (9, Cin_p, Cout_p)    bf16 (weight scale folded in)
    b_ref : (1, Cout_p)           f32
    o_ref : (TH*WP, Cout_p)       bf16 flat output block (cols W..W+1 are junk,
                                  dropped by the wrapper)
    """
    b = pl.program_id(0)
    i = pl.program_id(1)
    row0 = pl.multiple_of(i * (th * wp), 8)
    copy = pltpu.make_async_copy(x_hbm.at[b, pl.ds(row0, n_copy)],
                                 xbuf.at[pl.ds(0, n_copy)], sem)
    copy.start()
    copy.wait()
    # TODO(synk): double-buffer this halo fetch (prefetch the next grid point)
    # to overlap the DMA with the 9 MXU matmuls.

    m = th * wp
    acc_ref[...] = jnp.dot(xbuf[0:m, :], w_ref[0],
                           preferred_element_type=jnp.float32)
    for dy in range(3):
        for dx in range(3):
            if dy == 0 and dx == 0:
                continue
            off = dy * wp + dx
            acc_ref[...] += jnp.dot(xbuf[off:off + m, :], w_ref[dy * 3 + dx],
                                    preferred_element_type=jnp.float32)

    y = acc_ref[...] + b_ref[...]
    y = jnp.maximum(y, _LEAK * y)                       # LeakyReLU(0.2)
    y = y * jax.lax.rsqrt(                              # PixelNorm, TRUE channels
        jnp.sum(y * y, axis=-1, keepdims=True) * (1.0 / true_cout) + _EPS)
    o_ref[...] = y.astype(o_ref.dtype)


def _fade_tanh_kernel(a_ref, ups_ref, gen_ref, o_ref):
    """tanh(alpha * generated + (1 - alpha) * upscaled), lane-dense."""
    a = a_ref[...].astype(jnp.float32)                  # (1, Cp) broadcast row
    g = gen_ref[...].astype(jnp.float32)
    u = ups_ref[...].astype(jnp.float32)
    o_ref[...] = jnp.tanh(a * g + (1.0 - a) * u)


# ---------------------------------------------------------------------------
# Pallas wrappers
# ---------------------------------------------------------------------------
def ws_gemm(x, w, b, *, input_pn=False, pn_dim=1, leaky=False,
            out_dtype=jnp.float32):
    m, k = x.shape
    co = w.shape[1]
    xb = jnp.dtype(x.dtype).itemsize
    ob = jnp.dtype(out_dtype).itemsize
    tm = _pick_tm(m, k * xb + co * ob)
    need = 2 * tm * (k * xb + co * ob) + k * co * 2 + co * 4
    kern = partial(_gemm_kernel, input_pn=input_pn, pn_dim=float(pn_dim),
                   leaky=leaky)
    return pl.pallas_call(
        kern,
        out_shape=jax.ShapeDtypeStruct((m, co), out_dtype),
        grid_spec=pltpu.PrefetchScalarGridSpec(
            num_scalar_prefetch=0,
            grid=(pl.cdiv(m, tm),),
            in_specs=[pl.BlockSpec((tm, k), lambda i: (i, 0)),
                      pl.BlockSpec((k, co), lambda i: (0, 0)),
                      pl.BlockSpec((1, co), lambda i: (0, 0))],
            out_specs=pl.BlockSpec((tm, co), lambda i: (i, 0))),
        compiler_params=pltpu.CompilerParams(
            dimension_semantics=("parallel",),
            vmem_limit_bytes=_vmem_limit(need)),
    )(x, w, b)


def _pick_rows(h, wp, cin_p, cout_p):
    th = h
    while th > 4:
        need = (((th + 2) * wp + 8) * cin_p * 2 + th * wp * cout_p * 4
                + 2 * th * wp * cout_p * 2 + 9 * cin_p * cout_p * 2)
        if need <= _VMEM_BUDGET:
            break
        th //= 2
    return th


def conv3x3_pn(p, x):
    """WSConv2d(3x3, pad 1) -> LeakyReLU(0.2) -> PixelNorm.  x: (N,H,W,Cp) bf16."""
    n, h, w, cin_p = x.shape
    cout_p = p["w"].shape[-1]
    wp = w + 2
    th = _pick_rows(h, wp, cin_p, cout_p)
    nblk = h // th
    n_copy = (th + 2) * wp
    # Zero-pad the H/W borders once (cheap XLA copy) and flatten rows so all
    # in-kernel accesses are simple 2-D row ranges (no in-kernel reshapes).
    xpad = jnp.pad(x, ((0, 0), (1, 1), (1, 1), (0, 0)))
    xpad = xpad.reshape(n, (h + 2) * wp, cin_p)

    kern = partial(_conv3x3_kernel, th=th, wp=wp, n_copy=n_copy,
                   true_cout=float(p["cout"]))
    need = ((n_copy + 8) * cin_p * 2 + th * wp * cout_p * 4
            + 2 * th * wp * cout_p * 2 + 9 * cin_p * cout_p * 2 + cout_p * 4)
    out_flat = pl.pallas_call(
        kern,
        out_shape=jax.ShapeDtypeStruct((n * h * wp, cout_p), jnp.bfloat16),
        grid_spec=pltpu.PrefetchScalarGridSpec(
            num_scalar_prefetch=0,
            grid=(n, nblk),
            in_specs=[pl.BlockSpec(memory_space=pl.ANY),          # activation in HBM
                      pl.BlockSpec((9, cin_p, cout_p), lambda b, i: (0, 0, 0)),
                      pl.BlockSpec((1, cout_p), lambda b, i: (0, 0))],
            out_specs=pl.BlockSpec((th * wp, cout_p),
                                   lambda b, i: (b * nblk + i, 0)),
            scratch_shapes=[pltpu.VMEM((n_copy + 8, cin_p), jnp.bfloat16),
                            pltpu.VMEM((th * wp, cout_p), jnp.float32),
                            pltpu.SemaphoreType.DMA]),
        compiler_params=pltpu.CompilerParams(
            dimension_semantics=("parallel", "parallel"),
            vmem_limit_bytes=_vmem_limit(need)),
    )(xpad, p["w"], p["b"])
    return out_flat.reshape(n, h, wp, cout_p)[:, :, :w, :]


def fade_in(alpha, upscaled, generated):
    """tanh(alpha*generated + (1-alpha)*upscaled).  Inputs: (M, Cp) f32."""
    m, cp = generated.shape
    a = jnp.full((1, cp), alpha, jnp.float32)
    tm = _pick_tm(m, 3 * cp * 4)
    need = 2 * tm * 3 * cp * 4 + cp * 4
    return pl.pallas_call(
        _fade_tanh_kernel,
        out_shape=jax.ShapeDtypeStruct((m, cp), jnp.float32),
        grid_spec=pltpu.PrefetchScalarGridSpec(
            num_scalar_prefetch=0,
            grid=(pl.cdiv(m, tm),),
            in_specs=[pl.BlockSpec((1, cp), lambda i: (0, 0)),
                      pl.BlockSpec((tm, cp), lambda i: (i, 0)),
                      pl.BlockSpec((tm, cp), lambda i: (i, 0))],
            out_specs=pl.BlockSpec((tm, cp), lambda i: (i, 0))),
        compiler_params=pltpu.CompilerParams(
            dimension_semantics=("parallel",),
            vmem_limit_bytes=_vmem_limit(need)),
    )(a, upscaled, generated)


# ---------------------------------------------------------------------------
# JAX glue: upsample (pure data movement)
# ---------------------------------------------------------------------------
def upsample2x(x):
    """Nearest-neighbor 2x upsample, NHWC."""
    # TODO(synk): fuse the upsample into the 3x3-conv halo DMA so the 4x-larger
    # tensor never round-trips through HBM.
    return jnp.repeat(jnp.repeat(x, 2, axis=1), 2, axis=2)


# ---------------------------------------------------------------------------
# Parameter construction (deterministic, synthetic — no checkpoint loading).
# Weight-standardization scale is folded into the weights; channels are
# zero-padded to 128 lanes; weights stored bf16, biases f32.
# ---------------------------------------------------------------------------
def _ws_conv3_params(key, cin, cout):
    cin_p, cout_p = _pad_lanes(cin), _pad_lanes(cout)
    scale = (2.0 / (cin * 9)) ** 0.5
    w = jax.random.normal(key, (3, 3, cin, cout), jnp.float32) * scale
    wp = jnp.zeros((9, cin_p, cout_p), jnp.float32)
    wp = wp.at[:, :cin, :cout].set(w.reshape(9, cin, cout))
    return {"w": wp.astype(jnp.bfloat16),
            "b": jnp.zeros((1, cout_p), jnp.float32),
            "cout": cout}


def _ws_conv1_params(key, cin, cout):
    cin_p, cout_p = _pad_lanes(cin), _pad_lanes(cout)
    scale = (2.0 / cin) ** 0.5
    w = jax.random.normal(key, (cin, cout), jnp.float32) * scale
    wp = jnp.zeros((cin_p, cout_p), jnp.float32).at[:cin, :cout].set(w)
    return {"w": wp.astype(jnp.bfloat16),
            "b": jnp.zeros((1, cout_p), jnp.float32),
            "cout": cout}


def init_generator_params(key, z_dim, in_channels, img_channels, max_steps):
    keys = iter(jax.random.split(key, 4 + 3 * max_steps))
    cp = _pad_lanes(in_channels)
    zp = _pad_lanes(z_dim)
    params = {"in_channels": in_channels, "cp": cp, "z_dim": z_dim, "zp": zp,
              "img_channels": img_channels}

    # init: ConvTranspose2d(z_dim, in_channels, 4, 1, 0) on 1x1 input == GEMM.
    w_t = jax.random.normal(next(keys), (z_dim, 4, 4, in_channels),
                            jnp.float32) * 0.1
    w_full = jnp.zeros((zp, 4, 4, cp), jnp.float32)
    w_full = w_full.at[:z_dim, :, :, :in_channels].set(w_t)
    params["convT_w"] = w_full.reshape(zp, 16 * cp).astype(jnp.bfloat16)
    params["convT_b"] = jnp.zeros((1, 16 * cp), jnp.float32)

    params["init_conv"] = _ws_conv3_params(next(keys), in_channels, in_channels)
    params["rgb"] = [_ws_conv1_params(next(keys), in_channels, img_channels)]
    params["prog"] = []
    for i in range(max_steps):
        cin = int(in_channels * factors[i])
        cout = int(in_channels * factors[i + 1])
        assert cin > 0 and cout > 0, "in_channels too small for requested steps"
        params["prog"].append({
            "conv1": _ws_conv3_params(next(keys), cin, cout),
            "conv2": _ws_conv3_params(next(keys), cout, cout),
        })
        params["rgb"].append(_ws_conv1_params(next(keys), cout, img_channels))
    return params


# ---------------------------------------------------------------------------
# Generator forward (mirrors the PyTorch module)
# ---------------------------------------------------------------------------
def conv_block(blk, x):
    """ConvBlock: (WSConv3x3 -> LeakyReLU -> PixelNorm) x 2."""
    y = conv3x3_pn(blk["conv1"], x)
    y = conv3x3_pn(blk["conv2"], y)
    return y


def rgb_layer(p, x):
    """WSConv2d 1x1 (no activation).  Returns flat (N*H*W, Cout_p) f32."""
    n, h, w, c = x.shape
    return ws_gemm(x.reshape(n * h * w, c), p["w"], p["b"],
                   out_dtype=jnp.float32)


def generator_forward(params, x, alpha, steps):
    """x: (N, z_dim, 1, 1) like the PyTorch module; returns NCHW (N, img, H, W)."""
    n = x.shape[0]
    cp = params["cp"]
    zdim, zp = params["z_dim"], params["zp"]
    imgc = params["img_channels"]

    z = x.reshape(n, zdim).astype(jnp.float32)
    z = jnp.pad(z, ((0, 0), (0, zp - zdim)))
    # init: PixelNorm -> ConvTranspose2d(4x4) -> LeakyReLU, fused in one GEMM.
    h0 = ws_gemm(z, params["convT_w"], params["convT_b"],
                 input_pn=True, pn_dim=zdim, leaky=True,
                 out_dtype=jnp.bfloat16)
    out = h0.reshape(n, 4, 4, cp)
    # init (cont): WSConv2d 3x3 -> LeakyReLU -> PixelNorm.
    out = conv3x3_pn(params["init_conv"], out)

    if steps == 0:
        y = rgb_layer(params["rgb"][0], out)
        y = y[:, :imgc].reshape(n, 4, 4, imgc)
        return jnp.transpose(y, (0, 3, 1, 2))

    upscaled = out
    for step in range(steps):
        upscaled = upsample2x(out)
        out = conv_block(params["prog"][step], upscaled)

    final_upscaled = rgb_layer(params["rgb"][steps - 1], upscaled)
    final_out = rgb_layer(params["rgb"][steps], out)
    y = fade_in(alpha, final_upscaled, final_out)          # (N*H*W, Cp) f32
    hw = 4 * (2 ** steps)
    y = y[:, :imgc].reshape(n, hw, hw, imgc)
    return jnp.transpose(y, (0, 3, 1, 2))                  # NCHW like PyTorch


# ---------------------------------------------------------------------------
if __name__ == "__main__":
    key = jax.random.PRNGKey(0)
    k_params, k_x = jax.random.split(key)

    z_dim, in_channels, img_channels = 16, 16, 3
    steps = 2          # 4x4 init -> 8x8 -> 16x16
    alpha = 0.5

    params = init_generator_params(k_params, z_dim, in_channels, img_channels,
                                   steps)
    x = jax.random.normal(k_x, (2, z_dim, 1, 1), jnp.float32)

    out = generator_forward(params, x, alpha, steps)
    out = jax.block_until_ready(out)

    hw = 4 * (2 ** steps)
    assert out.shape == (2, img_channels, hw, hw), out.shape
    assert bool(jnp.all(jnp.isfinite(out)))
    print("KERNEL_OK")
</pallas_src>

<mosaic_0001>
module attributes {stable_mosaic.version = 11 : i64} {
  func.func @_gemm_kernel(%arg0: i32, %arg1: memref<2x128xf32, #tpu.memory_space<vmem>>, %arg2: memref<128x2048xbf16, #tpu.memory_space<vmem>>, %arg3: memref<1x2048xf32, #tpu.memory_space<vmem>>, %arg4: memref<2x2048xbf16, #tpu.memory_space<vmem>>) attributes {dimension_semantics = [#tpu.dimension_semantics<parallel>], iteration_bounds = array<i64: 1>, scalar_prefetch = 0 : i64, scratch_operands = 0 : i64, tpu.core_type = #tpu.core_type<tc>, window_params = [{transform_indices = @transform_0, window_bounds = array<i64: 2, 128>}, {pipeline_mode = #tpu.pipeline_mode<synchronous>, transform_indices = @transform_1, window_bounds = array<i64: 128, 2048>}, {pipeline_mode = #tpu.pipeline_mode<synchronous>, transform_indices = @transform_2, window_bounds = array<i64: 1, 2048>}, {transform_indices = @transform_3, window_bounds = array<i64: 2, 2048>}]} {
    %c0 = arith.constant 0 : index
    %c0_0 = arith.constant 0 : index
    %0 = vector.load %arg1[%c0, %c0_0] : memref<2x128xf32, #tpu.memory_space<vmem>>, vector<2x128xf32>
    %1 = arith.mulf %0, %0 : vector<2x128xf32>
    %cst = arith.constant dense<0.000000e+00> : vector<2xf32>
    %2 = vector.multi_reduction <add>, %1, %cst [1] : vector<2x128xf32> to vector<2xf32>
    %3 = vector.shape_cast %2 : vector<2xf32> to vector<2x1xf32>
    %cst_1 = arith.constant 6.250000e-02 : f32
    %4 = vector.broadcast %cst_1 : f32 to vector<2x1xf32>
    %5 = arith.mulf %3, %4 : vector<2x1xf32>
    %cst_2 = arith.constant 9.99999993E-9 : f32
    %6 = vector.broadcast %cst_2 : f32 to vector<2x1xf32>
    %7 = arith.addf %5, %6 : vector<2x1xf32>
    %8 = math.rsqrt %7 : vector<2x1xf32>
    %9 = vector.broadcast %8 : vector<2x1xf32> to vector<2x128xf32>
    %10 = arith.mulf %0, %9 : vector<2x128xf32>
    %11 = arith.truncf %10 : vector<2x128xf32> to vector<2x128xbf16>
    %c0_3 = arith.constant 0 : index
    %c0_4 = arith.constant 0 : index
    %12 = vector.load %arg2[%c0_3, %c0_4] : memref<128x2048xbf16, #tpu.memory_space<vmem>>, vector<128x2048xbf16>
    %cst_5 = arith.constant dense<0.000000e+00> : vector<2x2048xf32>
    %13 = tpu.matmul %11, %12, %cst_5 {dimension_numbers = #tpu.dot_dimension_numbers<[1], [0], [0], [1], [0, 0, 1, 1], [], []>} : vector<2x128xbf16>, vector<128x2048xbf16>, vector<2x2048xf32> -> vector<2x2048xf32>
    %c0_6 = arith.constant 0 : index
    %c0_7 = arith.constant 0 : index
    %14 = vector.load %arg3[%c0_6, %c0_7] : memref<1x2048xf32, #tpu.memory_space<vmem>>, vector<1x2048xf32>
    %15 = vector.broadcast %14 : vector<1x2048xf32> to vector<2x2048xf32>
    %16 = arith.addf %13, %15 : vector<2x2048xf32>
    %cst_8 = arith.constant 2.000000e-01 : f32
    %17 = vector.broadcast %cst_8 : f32 to vector<2x2048xf32>
    %18 = arith.mulf %17, %16 : vector<2x2048xf32>
    %19 = arith.maximumf %16, %18 : vector<2x2048xf32>
    %20 = arith.truncf %19 : vector<2x2048xf32> to vector<2x2048xbf16>
    %c0_9 = arith.constant 0 : index
    %c0_10 = arith.constant 0 : index
    %21 = vector.load %arg4[%c0_9, %c0_10] : memref<2x2048xbf16, #tpu.memory_space<vmem>>, vector<2x2048xbf16>
    tpu.vector_store %arg4[%c0_9, %c0_10], %20 {strides = array<i32>} : memref<2x2048xbf16, #tpu.memory_space<vmem>>, vector<2x2048xbf16>,
    return
  }
  func.func @transform_0(%arg0: i32) -> (i32, i32) {
    %c0_i32 = arith.constant 0 : i32
    %c0_i32_0 = arith.constant 0 : i32
    return %arg0, %c0_i32 : i32, i32
  }
  func.func @transform_1(%arg0: i32) -> (i32, i32) {
    %c0_i32 = arith.constant 0 : i32
    %c0_i32_0 = arith.constant 0 : i32
    %c0_i32_1 = arith.constant 0 : i32
    return %c0_i32, %c0_i32_0 : i32, i32
  }
  func.func @transform_2(%arg0: i32) -> (i32, i32) {
    %c0_i32 = arith.constant 0 : i32
    %c0_i32_0 = arith.constant 0 : i32
    %c0_i32_1 = arith.constant 0 : i32
    return %c0_i32, %c0_i32_0 : i32, i32
  }
  func.func @transform_3(%arg0: i32) -> (i32, i32) {
    %c0_i32 = arith.constant 0 : i32
    %c0_i32_0 = arith.constant 0 : i32
    return %arg0, %c0_i32 : i32, i32
  }
}

</mosaic_0001>

<bundles_post_ra>
// kernel: tpu_custom_call.1
= control target key start
LH: loop header
LB: loop body
LE: loop exit
PB: predicated region body
PF: predicated region fallthrough
CT: control target
= control target key end

     0   :  { %8 = vsyncpa [#allocation3], 0  ;;  %s1822_s0 = inlined_call_operand.hbm [shape: f32[2,128], index: 0, kind: input, shape index: {}]   ;;  %s1823_s1 = inlined_call_operand.hbm [shape: bf16[128,2048], index: 1, kind: input, shape index: {}]   ;;  %s1824_s2 = inlined_call_operand.hbm [shape: f32[1,2048], index: 2, kind: input, shape index: {}]   ;;  %s1825_s3 = inlined_call_operand.hbm [shape: bf16[2,2048], index: 3, kind: output, shape index: {}]  }
   0x1   :  { %9 = vsyncpa [#allocation6], 0 }
   0x2   :  { %10 = vsyncpa [#allocation4], 0  ;;  %s1666_s12 = smov [#allocation5]   ;;  %s1572_s16 = scalar_lea.hbm %s1823_s1, 16384 }
   0x3   :  { %s26_s13 = sshll.u32 %s1666_s12, 4  ;;  %p1573_p0 = scmp.ne.s32.totalorder %s1823_s1, %s1572_s16  ;;  %s27_s13 = int_to_ptr.vmem [resolvable:$true] %s26_s13 }
   0x4   :  { %p1576_p1 = scmp.lt.u32.totalorder %s1572_s16, %s1823_s1 }
   0x6   :  { %p1578_p2 = pnand %p1576_p1, %p1573_p0 }
   0x8   :  { %1581 = shalt.err (!%p1578_p2)
}
   0x9   :  { %s1582_s21 = scalar_lea.vmem %s27_s13, 16384  ;;  %p1587_p4 = scmp.lt.s32.totalorder %s27_s13, %s27_s13 }
   0xa   :  { %p1583_p3 = scmp.ne.s32.totalorder %s27_s13, %s1582_s21  ;;  %p1588_p5 = scmp.lt.s32.totalorder %s1582_s21, %s1582_s21 }
   0xc   :  { %p1589_p6 = por %p1588_p5, %p1587_p4 }
   0xe   :  { %p1590_p7 = pnand %p1589_p6, %p1583_p3 }
  0x10   :  { %1593 = shalt.err (!%p1590_p7)
}
  0x11   :  { %s1667_s22 = smov 1024   ;;  %s1668_s23 = smov 64  }
  0x12   :  { %32 = dma.hbm_to_vmem [thread:$0]  %s1823_s1, 16384, %s27_s13, [#allocation6], %s1667_s22, %s1667_s22, %s1668_s23  }
  0x13   :  { %s1669_s26 = smov [#allocation2]   ;;  %s1670_s28 = smov [#allocation7]  }
  0x14   :  { %s17_s27 = sshll.u32 %s1669_s26, 4  ;;  %s39_s29 = sshll.u32 %s1670_s28, 4  ;;  %s18_s27 = int_to_ptr.vmem [resolvable:$true] %s17_s27  ;;  %s40_s29 = int_to_ptr.vmem [resolvable:$true] %s39_s29 }
  0x15   :  { %s1594_s5 = scalar_lea.hbm %s1822_s0, 32 }
  0x16   :  { %p1595_p8 = scmp.ne.s32.totalorder %s1822_s0, %s1594_s5  ;;  %p1598_p9 = scmp.lt.u32.totalorder %s1594_s5, %s1822_s0 }
  0x18   :  { %p1600_p10 = pnand %p1598_p9, %p1595_p8 }
  0x1a   :  { %1603 = shalt.err (!%p1600_p10)
}
  0x1b   :  { %s1604_s1 = scalar_lea.vmem %s18_s27, 32  ;;  %p1609_p12 = scmp.lt.s32.totalorder %s18_s27, %s18_s27 }
  0x1c   :  { %p1605_p11 = scmp.ne.s32.totalorder %s18_s27, %s1604_s1  ;;  %p1610_p13 = scmp.lt.s32.totalorder %s1604_s1, %s1604_s1 }
  0x1e   :  { %p1611_p0 = por %p1610_p13, %p1609_p12 }
  0x20   :  { %p1612_p1 = pnand %p1611_p0, %p1605_p11 }
  0x22   :  { %1615 = shalt.err (!%p1612_p1)
}
  0x23   :  { %20 = dma.hbm_to_vmem [thread:$0]  %s1822_s0, 32, %s18_s27, [#allocation3]  }
  0x24   :  { %s1616_s14 = scalar_lea.hbm %s1824_s2, 256 }
  0x25   :  { %p1617_p2 = scmp.ne.s32.totalorder %s1824_s2, %s1616_s14  ;;  %p1620_p3 = scmp.lt.u32.totalorder %s1616_s14, %s1824_s2 }
  0x27   :  { %p1622_p4 = pnand %p1620_p3, %p1617_p2 }
  0x29   :  { %1625 = shalt.err (!%p1622_p4)
}
  0x2a   :  { %s1626_s19 = scalar_lea.vmem %s40_s29, 256  ;;  %p1631_p6 = scmp.lt.s32.totalorder %s40_s29, %s40_s29 }
  0x2b   :  { %p1627_p5 = scmp.ne.s32.totalorder %s40_s29, %s1626_s19  ;;  %p1632_p7 = scmp.lt.s32.totalorder %s1626_s19, %s1626_s19 }
  0x2d   :  { %p1633_p8 = por %p1632_p7, %p1631_p6 }
  0x2f   :  { %p1634_p9 = pnand %p1633_p8, %p1627_p5 }
  0x31   :  { %1637 = shalt.err (!%p1634_p9)
}
  0x32   :  { %42 = dma.hbm_to_vmem [thread:$0]  %s1824_s2, 256, %s40_s29, [#allocation6]  }
  0x33   :  { %1660 = dma.done.wait [#allocation3], 32  }
  0x34   :  { %1661 = vsyncadd [#allocation3], 4294967264 }
  0x35   :  { %1662 = dma.done.wait [#allocation6], 16640  }
  0x36   :  { %1663 = vsyncadd [#allocation6], 4294950656  ;;  %v1730_v0 = vld [vmem:[#allocation2] sm:$0x3]  ;;  %vm55_vm0 = vcmask 1041408   ;;  %v64_v1 = vld [vmem:[#allocation5] sm:$0xff] }
  0x37   :  { %v72_v2 = vld [vmem:[#allocation5 + $0x40] sm:$0xff]  ;;  %v54_v3 = vmul.f32 %v1730_v0, %v1730_v0  ;;  %v65_v5 = vld [vmem:[#allocation5 + $0x8] sm:$0xff]  ;;  %s1673_s2 = smov [#allocation8]  }
  0x38   :  { %v1427_v4 = vcombine.high %v64_v1, %v72_v2  ;;  %v73_v6 = vld [vmem:[#allocation5 + $0x48] sm:$0xff]  ;;  %v1426_v7 = vcombine.low %v64_v1, %v72_v2  ;;  %v80_v8 = vld [vmem:[#allocation5 + $0x80] sm:$0xff]  ;;  %s1416_s21 = sshll.u32 %s1673_s2, 4  ;;  %s1417_s21 = int_to_ptr.vmem [resolvable:$true] %s1416_s21 }
  0x39   :  { %v1429_v9 = vcombine.high %v65_v5, %v73_v6  ;;  %v1428_v10 = vcombine.low %v65_v5, %v73_v6  ;;  %v88_v11 = vld [vmem:[#allocation5 + $0xc0] sm:$0xff]  ;;  %v81_v12 = vld [vmem:[#allocation5 + $0x88] sm:$0xff]  ;;  %v56_v14 = vsel %vm55_vm0, %v54_v3, 0.0  ;;  %v74_v5 = vld [vmem:[#allocation5 + $0x50] sm:$0xff]  ;;  %s1638_s22 = scalar_lea.vmem %s1417_s21, 256  ;;  %p1643_p11 = scmp.lt.s32.totalorder %s1417_s21, %s1417_s21 }
  0x3a   :  { %v89_v13 = vld [vmem:[#allocation5 + $0xc8] sm:$0xff]  ;;  %916 = vmatprep.subr.bf16.mxu0 %v1427_v4  ;;  %v1443_v15 = vcombine.high %v80_v8, %v88_v11  ;;  %v96_v17 = vld [vmem:[#allocation5 + $0x100] sm:$0xff]  ;;  %57 = vadd.xlane.f32.xlu0 %v56_v14  ;;  %v1442_v21 = vcombine.low %v80_v8, %v88_v11  ;;  %v66_v4 = vld [vmem:[#allocation5 + $0x10] sm:$0xff]  ;;  %p1639_p10 = scmp.ne.s32.totalorder %s1417_s21, %s1638_s22  ;;  %p1644_p12 = scmp.lt.s32.totalorder %s1638_s22, %s1638_s22 }
  0x3b   :  { %v1445_v16 = vcombine.high %v81_v12, %v89_v13  ;;  %v104_v18 = vld [vmem:[#allocation5 + $0x140] sm:$0xff]  ;;  %v97_v19 = vld [vmem:[#allocation5 + $0x108] sm:$0xff]  ;;  %957 = vmatprep.subr.bf16.mxu1 %v1429_v9  ;;  %917 = vmatpush1.bf16.msra.mxu0 %v1426_v7  ;;  %v1444_v22 = vcombine.low %v81_v12, %v89_v13  ;;  %v67_v6 = vld [vmem:[#allocation5 + $0x18] sm:$0xff]  ;;  %v1431_v7 = vcombine.high %v66_v4, %v74_v5  ;;  %v1671_v12 = vmov 0  }
  0x3c   :  { %v105_v20 = vld [vmem:[#allocation5 + $0x148] sm:$0xff]  ;;  %958 = vmatpush1.bf16.msra.mxu1 %v1428_v10  ;;  %918 = vmatprep.subr.bf16.mxu0 %v1443_v15  ;;  %v1459_v23 = vcombine.high %v96_v17, %v104_v18  ;;  %v112_v25 = vld [vmem:[#allocation5 + $0x180] sm:$0xff]  ;;  %v1458_v29 = vcombine.low %v96_v17, %v104_v18  ;;  %v75_v8 = vld [vmem:[#allocation5 + $0x58] sm:$0xff]  ;;  %v1430_v9 = vcombine.low %v66_v4, %v74_v5  ;;  %p1645_p13 = por %p1644_p12, %p1643_p11 }
  0x3d   :  { %959 = vmatprep.subr.bf16.mxu1 %v1445_v16  ;;  %v1461_v24 = vcombine.high %v97_v19, %v105_v20  ;;  %v120_v26 = vld [vmem:[#allocation5 + $0x1c0] sm:$0xff]  ;;  %v113_v27 = vld [vmem:[#allocation5 + $0x188] sm:$0xff]  ;;  %v1460_v30 = vcombine.low %v97_v19, %v105_v20  ;;  %v1432_v10 = vcombine.low %v67_v6, %v75_v8  ;;  %v1433_v11 = vcombine.high %v67_v6, %v75_v8  ;;  %v82_v16 = vld [vmem:[#allocation5 + $0x90] sm:$0xff] }
  0x3e   :  { %v121_v28 = vld [vmem:[#allocation5 + $0x1c8] sm:$0xff]  ;;  %v1475_v31 = vcombine.high %v112_v25, %v120_v26  ;;  %v1474_v33 = vcombine.low %v112_v25, %v120_v26  ;;  %v128_v35 = vld [vmem:[#allocation5 + $0x200] sm:$0xff]  ;;  %948 = vmatprep.mubr.bf16.mxu0 %v1671_v12  ;;  %989 = vmatprep.mubr.bf16.mxu1 %v1671_v12  ;;  %v90_v18 = vld [vmem:[#allocation5 + $0xd0] sm:$0xff]  ;;  %p1646_p0 = pnand %p1645_p13, %p1639_p10 }
  0x3f   :  { %919 = vmatpush1.bf16.msra.mxu0 %v1442_v21  ;;  %v1477_v32 = vcombine.high %v113_v27, %v121_v28  ;;  %v1476_v34 = vcombine.low %v113_v27, %v121_v28  ;;  %v136_v36 = vld [vmem:[#allocation5 + $0x240] sm:$0xff]  ;;  %v129_v37 = vld [vmem:[#allocation5 + $0x208] sm:$0xff]  ;;  %v83_v19 = vld [vmem:[#allocation5 + $0x98] sm:$0xff] }
  0x40   :  { %960 = vmatpush1.bf16.msra.mxu1 %v1444_v22  ;;  %920 = vmatprep.subr.bf16.mxu0 %v1459_v23  ;;  %v1491_v38 = vcombine.high %v128_v35, %v136_v36  ;;  %v137_v39 = vld [vmem:[#allocation5 + $0x248] sm:$0xff]  ;;  %v1490_v41 = vcombine.low %v128_v35, %v136_v36  ;;  %v144_v43 = vld [vmem:[#allocation5 + $0x280] sm:$0xff]  ;;  %v91_v20 = vld [vmem:[#allocation5 + $0xd8] sm:$0xff]  ;;  %v1447_v23 = vcombine.high %v82_v16, %v90_v18 }
  0x41   :  { %961 = vmatprep.subr.bf16.mxu1 %v1461_v24  ;;  %v1493_v40 = vcombine.high %v129_v37, %v137_v39  ;;  %v1492_v42 = vcombine.low %v129_v37, %v137_v39  ;;  %v152_v44 = vld [vmem:[#allocation5 + $0x2c0] sm:$0xff]  ;;  %v145_v45 = vld [vmem:[#allocation5 + $0x288] sm:$0xff]  ;;  %v1449_v24 = vcombine.high %v83_v19, %v91_v20  ;;  %v98_v25 = vld [vmem:[#allocation5 + $0x110] sm:$0xff] }
  0x42   :  { %v1507_v46 = vcombine.high %v144_v43, %v152_v44  ;;  %v153_v47 = vld [vmem:[#allocation5 + $0x2c8] sm:$0xff]  ;;  %v1506_v49 = vcombine.low %v144_v43, %v152_v44  ;;  %v160_v51 = vld [vmem:[#allocation5 + $0x300] sm:$0xff]  ;;  %v106_v26 = vld [vmem:[#allocation5 + $0x150] sm:$0xff] }
  0x43   :  { %921 = vmatpush1.bf16.msra.mxu0 %v1458_v29  ;;  %v1509_v48 = vcombine.high %v145_v45, %v153_v47  ;;  %v1508_v50 = vcombine.low %v145_v45, %v153_v47  ;;  %v168_v52 = vld [vmem:[#allocation5 + $0x340] sm:$0xff]  ;;  %v161_v53 = vld [vmem:[#allocation5 + $0x308] sm:$0xff]  ;;  %v99_v27 = vld [vmem:[#allocation5 + $0x118] sm:$0xff]  ;;  %v1446_v29 = vcombine.low %v82_v16, %v90_v18  ;;  %v1462_v36 = vcombine.low %v98_v25, %v106_v26 }
  0x44   :  { %962 = vmatpush1.bf16.msra.mxu1 %v1460_v30  ;;  %922 = vmatprep.subr.bf16.mxu0 %v1475_v31  ;;  %v1523_v54 = vcombine.high %v160_v51, %v168_v52  ;;  %v169_v55 = vld [vmem:[#allocation5 + $0x348] sm:$0xff]  ;;  %v1522_v57 = vcombine.low %v160_v51, %v168_v52  ;;  %v176_v59 = vld [vmem:[#allocation5 + $0x380] sm:$0xff]  ;;  %v107_v28 = vld [vmem:[#allocation5 + $0x158] sm:$0xff]  ;;  %v1448_v30 = vcombine.low %v83_v19, %v91_v20 }
  0x45   :  { %963 = vmatprep.subr.bf16.mxu1 %v1477_v32  ;;  %v1525_v56 = vcombine.high %v161_v53, %v169_v55  ;;  %v1524_v58 = vcombine.low %v161_v53, %v169_v55  ;;  %v184_v60 = vld [vmem:[#allocation5 + $0x3c0] sm:$0xff]  ;;  %v177_v61 = vld [vmem:[#allocation5 + $0x388] sm:$0xff]  ;;  %v1463_v31 = vcombine.high %v98_v25, %v106_v26  ;;  %v114_v32 = vld [vmem:[#allocation5 + $0x190] sm:$0xff]  ;;  %v1464_v37 = vcombine.low %v99_v27, %v107_v28 }
  0x46   :  { %v1539_v62 = vcombine.high %v176_v59, %v184_v60  ;;  %v185_v63 = vld [vmem:[#allocation5 + $0x3c8] sm:$0xff]  ;;  %v1538_v2 = vcombine.low %v176_v59, %v184_v60  ;;  %v123_v35 = vld [vmem:[#allocation5 + $0x1d8] sm:$0xff]  ;;  %v84_v18 = vld [vmem:[#allocation5 + $0xa0] sm:$0xff] }
  0x47   :  { %923 = vmatpush1.bf16.msra.mxu0 %v1474_v33  ;;  %v1541_v1 = vcombine.high %v177_v61, %v185_v63  ;;  %v1540_v3 = vcombine.low %v177_v61, %v185_v63  ;;  %v122_v33 = vld [vmem:[#allocation5 + $0x1d0] sm:$0xff]  ;;  %v139_v43 = vld [vmem:[#allocation5 + $0x258] sm:$0xff]  ;;  %v92_v19 = vld [vmem:[#allocation5 + $0xe0] sm:$0xff] }
  0x48   :  { %964 = vmatpush1.bf16.msra.mxu1 %v1476_v34  ;;  %924 = vmatprep.subr.bf16.mxu0 %v1491_v38  ;;  %v115_v34 = vld [vmem:[#allocation5 + $0x198] sm:$0xff]  ;;  %v1479_v38 = vcombine.high %v114_v32, %v122_v33  ;;  %v1478_v44 = vcombine.low %v114_v32, %v122_v33  ;;  %v85_v20 = vld [vmem:[#allocation5 + $0xa8] sm:$0xff]  ;;  %v1451_v25 = vcombine.high %v84_v18, %v92_v19 }
  0x49   :  { %965 = vmatprep.subr.bf16.mxu1 %v1493_v40  ;;  %v1481_v39 = vcombine.high %v115_v34, %v123_v35  ;;  %v130_v40 = vld [vmem:[#allocation5 + $0x210] sm:$0xff]  ;;  %v1480_v45 = vcombine.low %v115_v34, %v123_v35  ;;  %v155_v51 = vld [vmem:[#allocation5 + $0x2d8] sm:$0xff]  ;;  %v116_v34 = vld [vmem:[#allocation5 + $0x1a0] sm:$0xff] }
  0x4a   :  { %v171_v59 = vld [vmem:[#allocation5 + $0x358] sm:$0xff]  ;;  %v124_v35 = vld [vmem:[#allocation5 + $0x1e0] sm:$0xff] }
  0x4b   :  { %925 = vmatpush1.bf16.msra.mxu0 %v1490_v41  ;;  %v138_v41 = vld [vmem:[#allocation5 + $0x250] sm:$0xff]  ;;  %v187_v4 = vld [vmem:[#allocation5 + $0x3d8] sm:$0xff] }
  0x4c   :  { %966 = vmatpush1.bf16.msra.mxu1 %v1492_v42  ;;  %926 = vmatprep.subr.bf16.mxu0 %v1507_v46  ;;  %v131_v42 = vld [vmem:[#allocation5 + $0x218] sm:$0xff]  ;;  %v1495_v46 = vcombine.high %v130_v40, %v138_v41  ;;  %v1494_v52 = vcombine.low %v130_v40, %v138_v41  ;;  %v1483_v40 = vcombine.high %v116_v34, %v124_v35 }
  0x4d   :  { %967 = vmatprep.subr.bf16.mxu1 %v1509_v48  ;;  %v1497_v47 = vcombine.high %v131_v42, %v139_v43  ;;  %v146_v48 = vld [vmem:[#allocation5 + $0x290] sm:$0xff]  ;;  %v1496_v53 = vcombine.low %v131_v42, %v139_v43  ;;  %v132_v42 = vld [vmem:[#allocation5 + $0x220] sm:$0xff] }
  0x4e   :  { %v140_v43 = vld [vmem:[#allocation5 + $0x260] sm:$0xff] }
  0x4f   :  { %927 = vmatpush1.bf16.msra.mxu0 %v1506_v49  ;;  %v154_v49 = vld [vmem:[#allocation5 + $0x2d0] sm:$0xff] }
  0x50   :  { %968 = vmatpush1.bf16.msra.mxu1 %v1508_v50  ;;  %928 = vmatprep.subr.bf16.mxu0 %v1523_v54  ;;  %v147_v50 = vld [vmem:[#allocation5 + $0x298] sm:$0xff]  ;;  %v1511_v54 = vcombine.high %v146_v48, %v154_v49  ;;  %v1510_v60 = vcombine.low %v146_v48, %v154_v49  ;;  %v1499_v48 = vcombine.high %v132_v42, %v140_v43 }
  0x51   :  { %969 = vmatprep.subr.bf16.mxu1 %v1525_v56  ;;  %v1513_v55 = vcombine.high %v147_v50, %v155_v51  ;;  %v162_v56 = vld [vmem:[#allocation5 + $0x310] sm:$0xff]  ;;  %v1512_v61 = vcombine.low %v147_v50, %v155_v51  ;;  %v148_v50 = vld [vmem:[#allocation5 + $0x2a0] sm:$0xff] }
  0x52   :  { %v156_v51 = vld [vmem:[#allocation5 + $0x2e0] sm:$0xff] }
  0x53   :  { %929 = vmatpush1.bf16.msra.mxu0 %v1522_v57  ;;  %v170_v57 = vld [vmem:[#allocation5 + $0x350] sm:$0xff] }
  0x54   :  { %970 = vmatpush1.bf16.msra.mxu1 %v1524_v58  ;;  %930 = vmatprep.subr.bf16.mxu0 %v1539_v62  ;;  %v163_v58 = vld [vmem:[#allocation5 + $0x318] sm:$0xff]  ;;  %v1527_v62 = vcombine.high %v162_v56, %v170_v57  ;;  %v1526_v5 = vcombine.low %v162_v56, %v170_v57  ;;  %v1515_v56 = vcombine.high %v148_v50, %v156_v51 }
  0x55   :  { %971 = vmatprep.subr.bf16.mxu1 %v1541_v1  ;;  %v1529_v63 = vcombine.high %v163_v58, %v171_v59  ;;  %v178_v1 = vld [vmem:[#allocation5 + $0x390] sm:$0xff]  ;;  %v1528_v6 = vcombine.low %v163_v58, %v171_v59  ;;  %v164_v58 = vld [vmem:[#allocation5 + $0x320] sm:$0xff] }
  0x56   :  { %v172_v59 = vld [vmem:[#allocation5 + $0x360] sm:$0xff] }
  0x57   :  { %931 = vmatpush1.bf16.msra.mxu0 %v1538_v2  ;;  %v186_v2 = vld [vmem:[#allocation5 + $0x3d0] sm:$0xff] }
  0x58   :  { %972 = vmatpush1.bf16.msra.mxu1 %v1540_v3  ;;  %998 = vmatprep.subr.bf16.mxu0 %v1431_v7  ;;  %v179_v3 = vld [vmem:[#allocation5 + $0x398] sm:$0xff]  ;;  %v1543_v7 = vcombine.high %v178_v1, %v186_v2 }
  0x59   :  { %1039 = vmatprep.subr.bf16.mxu1 %v1433_v11  ;;  %v1545_v8 = vcombine.high %v179_v3, %v187_v4  ;;  %v69_v11 = vld [vmem:[#allocation5 + $0x28] sm:$0xff] }
  0xc7   :  { %v58_v13 = vpop.xlane.xlu0 %57 }
  0xc8   :  { %v59_v14 = vmul.f32 0.0625, %v58_v13  ;;  %v77_v13 = vld [vmem:[#allocation5 + $0x68] sm:$0xff] }
  0xca   :  { %v60_v15 = vadd.f32 1e-08, %v59_v14  ;;  %v1542_v14 = vcombine.low %v178_v1, %v186_v2  ;;  %v1531_v1 = vcombine.high %v164_v58, %v172_v59 }
  0xcc   :  { %1570 = vrsqrt.f32 %v60_v15  ;;  %v1544_v15 = vcombine.low %v179_v3, %v187_v4  ;;  %v180_v3 = vld [vmem:[#allocation5 + $0x3a0] sm:$0xff] }
  0xcd   :  { %v188_v4 = vld [vmem:[#allocation5 + $0x3e0] sm:$0xff] }
  0xd6   :  { %v1571_v17 = vpop.eup %1570 }
  0xd7   :  { %v62_v21 = vmul.f32 %v1571_v17, %v1730_v0  ;;  %v1465_v0 = vcombine.high %v99_v27, %v107_v28  ;;  %v1437_v17 = vcombine.high %v69_v11, %v77_v13  ;;  %v100_v27 = vld [vmem:[#allocation5 + $0x120] sm:$0xff] }
  0xd8   :  { %v108_v28 = vld [vmem:[#allocation5 + $0x160] sm:$0xff] }
  0xd9   :  { %v1737_v22 = vpack.c.bf16 %v62_v21, %v62_v21  ;;  %v93_v21 = vld [vmem:[#allocation5 + $0xe8] sm:$0xff]  ;;  %v1467_v32 = vcombine.high %v100_v27, %v108_v28 }
  0xda   :  { %v1453_v26 = vcombine.high %v85_v20, %v93_v21 }
  0xdb   :  { %949 = vmatmul.mubr.bf16.vlgmr.msra.gmra.mrb[0].mxu0 %v1737_v22  ;;  %990 = vmatmul.mubr.bf16.vlgmr.msra.gmra.mrb[0].mxu1 %v1737_v22 }
  0xdc   :  { %999 = vmatpush1.bf16.msra.mxu0 %v1430_v9  ;;  %1040 = vmatpush1.bf16.msra.mxu1 %v1432_v10  ;;  %v68_v9 = vld [vmem:[#allocation5 + $0x20] sm:$0xff] }
  0xdd   :  { %1000 = vmatprep.subr.bf16.mxu0 %v1447_v23  ;;  %1041 = vmatprep.subr.bf16.mxu1 %v1449_v24  ;;  %v76_v10 = vld [vmem:[#allocation5 + $0x60] sm:$0xff]  ;;  %v1436_v24 = vcombine.low %v69_v11, %v77_v13  ;;  %v70_v11 = vld [vmem:[#allocation5 + $0x30] sm:$0xff] }
  0xde   :  { %1030 = vmatprep.mubr.bf16.mxu0 %v1671_v12  ;;  %1071 = vmatprep.mubr.bf16.mxu1 %v1671_v12  ;;  %v1435_v16 = vcombine.high %v68_v9, %v76_v10  ;;  %v1434_v23 = vcombine.low %v68_v9, %v76_v10  ;;  %v1547_v9 = vcombine.high %v180_v3, %v188_v4  ;;  %v78_v13 = vld [vmem:[#allocation5 + $0x70] sm:$0xff] }
  0xe0   :  { %1001 = vmatpush1.bf16.msra.mxu0 %v1446_v29  ;;  %1042 = vmatpush1.bf16.msra.mxu1 %v1448_v30  ;;  %v101_v29 = vld [vmem:[#allocation5 + $0x128] sm:$0xff] }
  0xe1   :  { %1002 = vmatprep.subr.bf16.mxu0 %v1463_v31  ;;  %1043 = vmatprep.subr.bf16.mxu1 %v1465_v0  ;;  %v109_v30 = vld [vmem:[#allocation5 + $0x168] sm:$0xff]  ;;  %v1450_v31 = vcombine.low %v84_v18, %v92_v19  ;;  %v1452_v0 = vcombine.low %v85_v20, %v93_v21  ;;  %v1439_v18 = vcombine.high %v70_v11, %v78_v13  ;;  %v86_v20 = vld [vmem:[#allocation5 + $0xb0] sm:$0xff] }
  0xe2   :  { %v1469_v33 = vcombine.high %v101_v29, %v109_v30  ;;  %v94_v21 = vld [vmem:[#allocation5 + $0xf0] sm:$0xff] }
  0xe4   :  { %1003 = vmatpush1.bf16.msra.mxu0 %v1462_v36  ;;  %1044 = vmatpush1.bf16.msra.mxu1 %v1464_v37  ;;  %v117_v36 = vld [vmem:[#allocation5 + $0x1a8] sm:$0xff] }
  0xe5   :  { %1004 = vmatprep.subr.bf16.mxu0 %v1479_v38  ;;  %1045 = vmatprep.subr.bf16.mxu1 %v1481_v39  ;;  %v125_v37 = vld [vmem:[#allocation5 + $0x1e8] sm:$0xff]  ;;  %v1466_v38 = vcombine.low %v100_v27, %v108_v28  ;;  %v1468_v39 = vcombine.low %v101_v29, %v109_v30  ;;  %v1455_v27 = vcombine.high %v86_v20, %v94_v21  ;;  %v102_v29 = vld [vmem:[#allocation5 + $0x130] sm:$0xff] }
  0xe6   :  { %v1485_v41 = vcombine.high %v117_v36, %v125_v37  ;;  %v110_v30 = vld [vmem:[#allocation5 + $0x170] sm:$0xff] }
  0xe8   :  { %1005 = vmatpush1.bf16.msra.mxu0 %v1478_v44  ;;  %1046 = vmatpush1.bf16.msra.mxu1 %v1480_v45  ;;  %v133_v44 = vld [vmem:[#allocation5 + $0x228] sm:$0xff] }
  0xe9   :  { %1006 = vmatprep.subr.bf16.mxu0 %v1495_v46  ;;  %1047 = vmatprep.subr.bf16.mxu1 %v1497_v47  ;;  %v141_v45 = vld [vmem:[#allocation5 + $0x268] sm:$0xff]  ;;  %v1482_v46 = vcombine.low %v116_v34, %v124_v35  ;;  %v1484_v47 = vcombine.low %v117_v36, %v125_v37  ;;  %v1471_v34 = vcombine.high %v102_v29, %v110_v30  ;;  %v118_v36 = vld [vmem:[#allocation5 + $0x1b0] sm:$0xff] }
  0xea   :  { %v1501_v49 = vcombine.high %v133_v44, %v141_v45  ;;  %v126_v37 = vld [vmem:[#allocation5 + $0x1f0] sm:$0xff] }
  0xec   :  { %1007 = vmatpush1.bf16.msra.mxu0 %v1494_v52  ;;  %1048 = vmatpush1.bf16.msra.mxu1 %v1496_v53  ;;  %v149_v52 = vld [vmem:[#allocation5 + $0x2a8] sm:$0xff] }
  0xed   :  { %1008 = vmatprep.subr.bf16.mxu0 %v1511_v54  ;;  %1049 = vmatprep.subr.bf16.mxu1 %v1513_v55  ;;  %v157_v53 = vld [vmem:[#allocation5 + $0x2e8] sm:$0xff]  ;;  %v1498_v54 = vcombine.low %v132_v42, %v140_v43  ;;  %v1500_v55 = vcombine.low %v133_v44, %v141_v45  ;;  %v1487_v42 = vcombine.high %v118_v36, %v126_v37  ;;  %v134_v44 = vld [vmem:[#allocation5 + $0x230] sm:$0xff] }
  0xee   :  { %v1517_v57 = vcombine.high %v149_v52, %v157_v53  ;;  %v142_v45 = vld [vmem:[#allocation5 + $0x270] sm:$0xff] }
  0xf0   :  { %1009 = vmatpush1.bf16.msra.mxu0 %v1510_v60  ;;  %1050 = vmatpush1.bf16.msra.mxu1 %v1512_v61  ;;  %v165_v60 = vld [vmem:[#allocation5 + $0x328] sm:$0xff] }
  0xf1   :  { %1010 = vmatprep.subr.bf16.mxu0 %v1527_v62  ;;  %1051 = vmatprep.subr.bf16.mxu1 %v1529_v63  ;;  %v173_v61 = vld [vmem:[#allocation5 + $0x368] sm:$0xff]  ;;  %v1514_v62 = vcombine.low %v148_v50, %v156_v51  ;;  %v1516_v63 = vcombine.low %v149_v52, %v157_v53  ;;  %v1503_v50 = vcombine.high %v134_v44, %v142_v45  ;;  %v150_v51 = vld [vmem:[#allocation5 + $0x2b0] sm:$0xff]  ;;  %v151_v53 = vld [vmem:[#allocation5 + $0x2b8] sm:$0xff] }
  0xf2   :  { %v1533_v2 = vcombine.high %v165_v60, %v173_v61  ;;  %v158_v52 = vld [vmem:[#allocation5 + $0x2f0] sm:$0xff] }
  0xf4   :  { %1011 = vmatpush1.bf16.msra.mxu0 %v1526_v5  ;;  %1052 = vmatpush1.bf16.msra.mxu1 %v1528_v6  ;;  %v181_v5 = vld [vmem:[#allocation5 + $0x3a8] sm:$0xff] }
  0xf5   :  { %1012 = vmatprep.subr.bf16.mxu0 %v1543_v7  ;;  %1053 = vmatprep.subr.bf16.mxu1 %v1545_v8  ;;  %v189_v6 = vld [vmem:[#allocation5 + $0x3e8] sm:$0xff]  ;;  %v1530_v7 = vcombine.low %v164_v58, %v172_v59  ;;  %v1532_v8 = vcombine.low %v165_v60, %v173_v61  ;;  %v166_v59 = vld [vmem:[#allocation5 + $0x330] sm:$0xff]  ;;  %v167_v61 = vld [vmem:[#allocation5 + $0x338] sm:$0xff] }
  0xf6   :  { %v1549_v10 = vcombine.high %v181_v5, %v189_v6  ;;  %v174_v60 = vld [vmem:[#allocation5 + $0x370] sm:$0xff] }
  0xf8   :  { %1013 = vmatpush1.bf16.msra.mxu0 %v1542_v14  ;;  %1054 = vmatpush1.bf16.msra.mxu1 %v1544_v15  ;;  %v71_v14 = vld [vmem:[#allocation5 + $0x38] sm:$0xff] }
  0xf9   :  { %1080 = vmatprep.subr.bf16.mxu0 %v1435_v16  ;;  %1121 = vmatprep.subr.bf16.mxu1 %v1437_v17  ;;  %v79_v15 = vld [vmem:[#allocation5 + $0x78] sm:$0xff]  ;;  %v1546_v16 = vcombine.low %v180_v3, %v188_v4  ;;  %v1548_v17 = vcombine.low %v181_v5, %v189_v6  ;;  %v182_v4 = vld [vmem:[#allocation5 + $0x3b0] sm:$0xff] }
  0xfa   :  { %v1441_v19 = vcombine.high %v71_v14, %v79_v15  ;;  %v190_v5 = vld [vmem:[#allocation5 + $0x3f0] sm:$0xff]  ;;  %v183_v6 = vld [vmem:[#allocation5 + $0x3b8] sm:$0xff] }
  0xfb   :  { %1031 = vmatmul.mubr.bf16.vlgmr.msra.gmra.mrb[4].mxu0 %v1737_v22  ;;  %1072 = vmatmul.mubr.bf16.vlgmr.msra.gmra.mrb[4].mxu1 %v1737_v22 }
  0xfc   :  { %1081 = vmatpush1.bf16.msra.mxu0 %v1434_v23  ;;  %1122 = vmatpush1.bf16.msra.mxu1 %v1436_v24  ;;  %v87_v23 = vld [vmem:[#allocation5 + $0xb8] sm:$0xff] }
  0xfd   :  { %1082 = vmatprep.subr.bf16.mxu0 %v1451_v25  ;;  %1123 = vmatprep.subr.bf16.mxu1 %v1453_v26  ;;  %v95_v24 = vld [vmem:[#allocation5 + $0xf8] sm:$0xff]  ;;  %v1438_v25 = vcombine.low %v70_v11, %v78_v13  ;;  %v1440_v26 = vcombine.low %v71_v14, %v79_v15  ;;  %v1550_v13 = vcombine.low %v182_v4, %v190_v5  ;;  %v196_v15 = vlaneseq }
  0xfe   :  { %1112 = vmatprep.mubr.bf16.mxu0 %v1671_v12  ;;  %1153 = vmatprep.mubr.bf16.mxu1 %v1671_v12  ;;  %v1457_v28 = vcombine.high %v87_v23, %v95_v24 }
 0x100   :  { %1083 = vmatpush1.bf16.msra.mxu0 %v1450_v31  ;;  %1124 = vmatpush1.bf16.msra.mxu1 %v1452_v0  ;;  %v103_v31 = vld [vmem:[#allocation5 + $0x138] sm:$0xff] }
 0x101   :  { %1084 = vmatprep.subr.bf16.mxu0 %v1467_v32  ;;  %1125 = vmatprep.subr.bf16.mxu1 %v1469_v33  ;;  %v111_v0 = vld [vmem:[#allocation5 + $0x178] sm:$0xff]  ;;  %v1454_v32 = vcombine.low %v86_v20, %v94_v21  ;;  %v1456_v33 = vcombine.low %v87_v23, %v95_v24 }
 0x102   :  { %v1473_v35 = vcombine.high %v103_v31, %v111_v0 }
 0x104   :  { %1085 = vmatpush1.bf16.msra.mxu0 %v1466_v38  ;;  %1126 = vmatpush1.bf16.msra.mxu1 %v1468_v39  ;;  %v119_v38 = vld [vmem:[#allocation5 + $0x1b8] sm:$0xff] }
 0x105   :  { %1086 = vmatprep.subr.bf16.mxu0 %v1483_v40  ;;  %1127 = vmatprep.subr.bf16.mxu1 %v1485_v41  ;;  %v127_v39 = vld [vmem:[#allocation5 + $0x1f8] sm:$0xff]  ;;  %v1470_v40 = vcombine.low %v102_v29, %v110_v30  ;;  %v1472_v41 = vcombine.low %v103_v31, %v111_v0 }
 0x106   :  { %v1489_v43 = vcombine.high %v119_v38, %v127_v39 }
 0x108   :  { %1087 = vmatpush1.bf16.msra.mxu0 %v1482_v46  ;;  %1128 = vmatpush1.bf16.msra.mxu1 %v1484_v47  ;;  %v135_v46 = vld [vmem:[#allocation5 + $0x238] sm:$0xff] }
 0x109   :  { %1088 = vmatprep.subr.bf16.mxu0 %v1499_v48  ;;  %1129 = vmatprep.subr.bf16.mxu1 %v1501_v49  ;;  %v143_v47 = vld [vmem:[#allocation5 + $0x278] sm:$0xff]  ;;  %v1486_v48 = vcombine.low %v118_v36, %v126_v37  ;;  %v1488_v49 = vcombine.low %v119_v38, %v127_v39 }
 0x10c   :  { %1089 = vmatpush1.bf16.msra.mxu0 %v1498_v54  ;;  %1130 = vmatpush1.bf16.msra.mxu1 %v1500_v55  ;;  %v159_v54 = vld [vmem:[#allocation5 + $0x2f8] sm:$0xff]  ;;  %v1502_v55 = vcombine.low %v134_v44, %v142_v45 }
 0x10d   :  { %1090 = vmatprep.subr.bf16.mxu0 %v1515_v56  ;;  %1131 = vmatprep.subr.bf16.mxu1 %v1517_v57  ;;  %v1504_v56 = vcombine.low %v135_v46, %v143_v47  ;;  %v1519_v57 = vcombine.high %v150_v51, %v158_v52  ;;  %v1521_v58 = vcombine.high %v151_v53, %v159_v54 }
 0x110   :  { %1091 = vmatpush1.bf16.msra.mxu0 %v1514_v62  ;;  %1132 = vmatpush1.bf16.msra.mxu1 %v1516_v63  ;;  %v175_v62 = vld [vmem:[#allocation5 + $0x378] sm:$0xff]  ;;  %v1518_v63 = vcombine.low %v150_v51, %v158_v52 }
 0x111   :  { %1092 = vmatprep.subr.bf16.mxu0 %v1531_v1  ;;  %1133 = vmatprep.subr.bf16.mxu1 %v1533_v2  ;;  %v1520_v1 = vcombine.low %v151_v53, %v159_v54  ;;  %v1535_v2 = vcombine.high %v166_v59, %v174_v60  ;;  %v1537_v3 = vcombine.high %v167_v61, %v175_v62 }
 0x114   :  { %1093 = vmatpush1.bf16.msra.mxu0 %v1530_v7  ;;  %1134 = vmatpush1.bf16.msra.mxu1 %v1532_v8  ;;  %v191_v7 = vld [vmem:[#allocation5 + $0x3f8] sm:$0xff]  ;;  %v1534_v8 = vcombine.low %v166_v59, %v174_v60 }
 0x115   :  { %1094 = vmatprep.subr.bf16.mxu0 %v1547_v9  ;;  %1135 = vmatprep.subr.bf16.mxu1 %v1549_v10  ;;  %v1536_v9 = vcombine.low %v167_v61, %v175_v62  ;;  %v1551_v10 = vcombine.high %v182_v4, %v190_v5  ;;  %v1553_v11 = vcombine.high %v183_v6, %v191_v7 }
 0x116   :  { %v1552_v14 = vcombine.low %v183_v6, %v191_v7 }
 0x118   :  { %1095 = vmatpush1.bf16.msra.mxu0 %v1546_v16  ;;  %1136 = vmatpush1.bf16.msra.mxu1 %v1548_v17  ;;  %v1753_v16 = vshrl.u32 %v196_v15, 7 }
 0x119   :  { %1162 = vmatprep.subr.bf16.mxu0 %v1439_v18  ;;  %1203 = vmatprep.subr.bf16.mxu1 %v1441_v19  ;;  %v192_v19 = vld [vmem:[#allocation7] sm:$0xff] }
 0x11a   :  { %v198_v17 = vsub.s32 0, %v1753_v16  ;;  %v206_v18 = vsub.s32 2, %v1753_v16  ;;  %v202_v20 = vsub.s32 1, %v1753_v16  ;;  %v210_v21 = vsub.s32 3, %v1753_v16 }
 0x11b   :  { %1113 = vmatmul.mubr.bf16.vlgmr.msra.gmra.mrb[8].mxu0 %v1737_v22  ;;  %1154 = vmatmul.mubr.bf16.vlgmr.msra.gmra.mrb[8].mxu1 %v1737_v22  ;;  %v214_v53 = vsub.s32 4, %v1753_v16  ;;  %v222_v54 = vsub.s32 6, %v1753_v16 }
 0x11c   :  { %1163 = vmatpush1.bf16.msra.mxu0 %v1438_v25  ;;  %1204 = vmatpush1.bf16.msra.mxu1 %v1440_v26  ;;  %v199_v23 = vrot.slane %v192_v19, %v198_v17  ;;  %v207_v24 = vrot.slane %v192_v19, %v206_v18  ;;  %v1672_v25 = vmov 1966171168  }
 0x11d   :  { %1164 = vmatprep.subr.bf16.mxu0 %v1455_v27  ;;  %1205 = vmatprep.subr.bf16.mxu1 %v1457_v28  ;;  %v1313_v26 = vunpack.c.l.s4 %v1672_v25  ;;  %v211_v27 = vrot.slane %v192_v19, %v210_v21 }
 0x11e   :  { %1194 = vmatprep.mubr.bf16.mxu0 %v1671_v12  ;;  %1235 = vmatprep.mubr.bf16.mxu1 %v1671_v12  ;;  %v1505_v12 = vcombine.high %v135_v46, %v143_v47 }
 0x120   :  { %1165 = vmatpush1.bf16.msra.mxu0 %v1454_v32  ;;  %1206 = vmatpush1.bf16.msra.mxu1 %v1456_v33 }
 0x121   :  { %1166 = vmatprep.subr.bf16.mxu0 %v1471_v34  ;;  %1207 = vmatprep.subr.bf16.mxu1 %v1473_v35  ;;  %v1314_v34 = vunpack.c.0.s8 %v1313_v26 }
 0x123   :  { %v1768_v47 = vsub.s32 %v1314_v34, %v1753_v16 }
 0x124   :  { %1167 = vmatpush1.bf16.msra.mxu0 %v1470_v40  ;;  %1208 = vmatpush1.bf16.msra.mxu1 %v1472_v41 }
 0x125   :  { %1168 = vmatprep.subr.bf16.mxu0 %v1487_v42  ;;  %1209 = vmatprep.subr.bf16.mxu1 %v1489_v43 }
 0x128   :  { %1169 = vmatpush1.bf16.msra.mxu0 %v1486_v48  ;;  %1210 = vmatpush1.bf16.msra.mxu1 %v1488_v49 }
 0x129   :  { %1170 = vmatprep.subr.bf16.mxu0 %v1503_v50  ;;  %1211 = vmatprep.subr.bf16.mxu1 %v1505_v12 }
 0x12c   :  { %1171 = vmatpush1.bf16.msra.mxu0 %v1502_v55  ;;  %1212 = vmatpush1.bf16.msra.mxu1 %v1504_v56  ;;  %v218_v55 = vsub.s32 5, %v1753_v16  ;;  %v226_v56 = vsub.s32 7, %v1753_v16 }
 0x12d   :  { %1172 = vmatprep.subr.bf16.mxu0 %v1519_v57  ;;  %1213 = vmatprep.subr.bf16.mxu1 %v1521_v58  ;;  %v215_v57 = vrot.slane %v192_v19, %v214_v53  ;;  %v223_v58 = vrot.slane %v192_v19, %v222_v54 }
 0x12e   :  { %v219_v59 = vrot.slane %v192_v19, %v218_v55  ;;  %v227_v60 = vrot.slane %v192_v19, %v226_v56 }
 0x130   :  { %1173 = vmatpush1.bf16.msra.mxu0 %v1518_v63  ;;  %1214 = vmatpush1.bf16.msra.mxu1 %v1520_v1 }
 0x131   :  { %1174 = vmatprep.subr.bf16.mxu0 %v1535_v2  ;;  %1215 = vmatprep.subr.bf16.mxu1 %v1537_v3 }
 0x134   :  { %1175 = vmatpush1.bf16.msra.mxu0 %v1534_v8  ;;  %1216 = vmatpush1.bf16.msra.mxu1 %v1536_v9 }
 0x135   :  { %1176 = vmatprep.subr.bf16.mxu0 %v1551_v10  ;;  %1217 = vmatprep.subr.bf16.mxu1 %v1553_v11 }
 0x138   :  { %1177 = vmatpush1.bf16.msra.mxu0 %v1550_v13  ;;  %1218 = vmatpush1.bf16.msra.mxu1 %v1552_v14 }
 0x13b   :  { %1195 = vmatmul.mubr.bf16.vlgmr.msra.gmra.mrb[12].mxu0 %v1737_v22  ;;  %1236 = vmatmul.mubr.bf16.vlgmr.msra.gmra.mrb[12].mxu1 %v1737_v22  ;;  %v203_v22 = vrot.slane %v192_v19, %v202_v20 }
 0x1ae   :  { %v950_v28 = vpop.f32.mrb[0].mxu0  ;;  %v991_v29 = vpop.f32.mrb[0].mxu1 }
 0x1af   :  { %v951_v30 = vadd.f32 %v950_v28, %v199_v23  ;;  %v992_v31 = vadd.f32 %v991_v29, %v207_v24  ;;  %v952_v0 = vpop.f32.mrb[1].mxu0  ;;  %v993_v32 = vpop.f32.mrb[1].mxu1 }
 0x1b0   :  { %v953_v33 = vadd.f32 %v952_v0, %v203_v22  ;;  %v994_v35 = vadd.f32 %v993_v32, %v211_v27  ;;  %v954_v36 = vpop.f32.mrb[2].mxu0  ;;  %v995_v37 = vpop.f32.mrb[2].mxu1  ;;  %v193_v0 = vld [vmem:[#allocation7 + $0x8] sm:$0xff] }
 0x1b1   :  { %v1244_v38 = vmul.f32 0.2, %v951_v30  ;;  %v1246_v39 = vmul.f32 0.2, %v992_v31  ;;  %v955_v40 = vpop.f32.mrb[3].mxu0  ;;  %v996_v41 = vpop.f32.mrb[3].mxu1  ;;  %v231_v32 = vrot.slane %v193_v0, %v198_v17  ;;  %v235_v34 = vrot.slane %v193_v0, %v202_v20 }
 0x1b2   :  { %v1245_v42 = vmul.f32 0.2, %v953_v33  ;;  %v1247_v43 = vmul.f32 0.2, %v994_v35 }
 0x1b3   :  { %v1260_v44 = vmax.f32 %v951_v30, %v1244_v38  ;;  %v1262_v45 = vmax.f32 %v992_v31, %v1246_v39 }
 0x1b4   :  { %v1261_v46 = vmax.f32 %v953_v33, %v1245_v42  ;;  %v1263_v48 = vmax.f32 %v994_v35, %v1247_v43  ;;  %v239_v33 = vrot.slane %v193_v0, %v206_v18  ;;  %v243_v35 = vrot.slane %v193_v0, %v210_v21 }
 0x1b6   :  { %v1554_v49 = vpack.c.bf16 %v1261_v46, %v1260_v44  ;;  %v1555_v50 = vpack.c.bf16 %v1263_v48, %v1262_v45 }
 0x1b8   :  { %v1318_v12 = vrot.slane %v1554_v49, %v1768_v47  ;;  %v1325_v51 = vrot.slane %v1555_v50, %v1768_v47 }
 0x1ba   :  { %v1340_v52 = vcombine.low %v1318_v12, %v1325_v51 }
 0x1bc   :  { %v1348_v29 = vrot.slane %v1340_v52, %v1768_v47 }
 0x1ce   :  { %v1032_v61 = vpop.f32.mrb[4].mxu0  ;;  %v1073_v62 = vpop.f32.mrb[4].mxu1 }
 0x1cf   :  { %v1033_v63 = vadd.f32 %v1032_v61, %v215_v57  ;;  %v1074_v1 = vadd.f32 %v1073_v62, %v223_v58  ;;  %v1034_v2 = vpop.f32.mrb[5].mxu0  ;;  %v1075_v3 = vpop.f32.mrb[5].mxu1  ;;  %v247_v61 = vrot.slane %v193_v0, %v214_v53  ;;  %v255_v62 = vrot.slane %v193_v0, %v222_v54 }
 0x1d0   :  { %v1035_v4 = vadd.f32 %v1034_v2, %v219_v59  ;;  %v1076_v5 = vadd.f32 %v1075_v3, %v227_v60  ;;  %v1036_v6 = vpop.f32.mrb[6].mxu0  ;;  %v1077_v7 = vpop.f32.mrb[6].mxu1 }
 0x1d1   :  { %v1248_v8 = vmul.f32 0.2, %v1033_v63  ;;  %v1250_v9 = vmul.f32 0.2, %v1074_v1  ;;  %v1037_v10 = vpop.f32.mrb[7].mxu0  ;;  %v1078_v11 = vpop.f32.mrb[7].mxu1 }
 0x1d2   :  { %v1249_v13 = vmul.f32 0.2, %v1035_v4  ;;  %v1251_v14 = vmul.f32 0.2, %v1076_v5 }
 0x1d3   :  { %v1264_v15 = vmax.f32 %v1033_v63, %v1248_v8  ;;  %v1266_v23 = vmax.f32 %v1074_v1, %v1250_v9  ;;  %v251_v63 = vrot.slane %v193_v0, %v218_v55  ;;  %v259_v1 = vrot.slane %v193_v0, %v226_v56 }
 0x1d4   :  { %v1265_v24 = vmax.f32 %v1035_v4, %v1249_v13  ;;  %v1267_v19 = vmax.f32 %v1076_v5, %v1251_v14 }
 0x1d6   :  { %v1556_v22 = vpack.c.bf16 %v1265_v24, %v1264_v15  ;;  %v1557_v25 = vpack.c.bf16 %v1267_v19, %v1266_v23 }
 0x1d8   :  { %v1332_v26 = vrot.slane %v1556_v22, %v1768_v47  ;;  %v1339_v27 = vrot.slane %v1557_v25, %v1768_v47 }
 0x1da   :  { %v1341_v28 = vcombine.low %v1332_v26, %v1339_v27 }
 0x1dc   :  { %v1355_v30 = vrot.slane %v1341_v28, %v1768_v47 }
 0x1de   :  { %v1356_v31 = vcombine.low %v1348_v29, %v1355_v30 }
 0x1e0   :  { %1408 = vst [vmem:[#allocation8] sm:$0xff] %v1356_v31 }
 0x1ee   :  { %v1114_v36 = vpop.f32.mrb[8].mxu0  ;;  %v1155_v37 = vpop.f32.mrb[8].mxu1 }
 0x1ef   :  { %v1115_v38 = vadd.f32 %v1114_v36, %v231_v32  ;;  %v1156_v39 = vadd.f32 %v1155_v37, %v239_v33  ;;  %v1116_v40 = vpop.f32.mrb[9].mxu0  ;;  %v1157_v41 = vpop.f32.mrb[9].mxu1 }
 0x1f0   :  { %v1117_v42 = vadd.f32 %v1116_v40, %v235_v34  ;;  %v1158_v43 = vadd.f32 %v1157_v41, %v243_v35  ;;  %v1118_v44 = vpop.f32.mrb[10].mxu0  ;;  %v1159_v45 = vpop.f32.mrb[10].mxu1 }
 0x1f1   :  { %v1252_v17 = vmul.f32 0.2, %v1115_v38  ;;  %v1254_v46 = vmul.f32 0.2, %v1156_v39  ;;  %v1119_v48 = vpop.f32.mrb[11].mxu0  ;;  %v1160_v18 = vpop.f32.mrb[11].mxu1 }
 0x1f2   :  { %v1253_v49 = vmul.f32 0.2, %v1117_v42  ;;  %v1255_v50 = vmul.f32 0.2, %v1158_v43 }
 0x1f3   :  { %v1268_v20 = vmax.f32 %v1115_v38, %v1252_v17  ;;  %v1270_v12 = vmax.f32 %v1156_v39, %v1254_v46 }
 0x1f4   :  { %v1269_v51 = vmax.f32 %v1117_v42, %v1253_v49  ;;  %v1271_v21 = vmax.f32 %v1158_v43, %v1255_v50 }
 0x1f6   :  { %v1558_v52 = vpack.c.bf16 %v1269_v51, %v1268_v20  ;;  %v1559_v57 = vpack.c.bf16 %v1271_v21, %v1270_v12 }
 0x1f8   :  { %v1367_v58 = vrot.slane %v1558_v52, %v1768_v47  ;;  %v1374_v59 = vrot.slane %v1559_v57, %v1768_v47 }
 0x1fa   :  { %v1389_v60 = vcombine.low %v1367_v58, %v1374_v59 }
 0x1fc   :  { %v1397_v28 = vrot.slane %v1389_v60, %v1768_v47 }
 0x20e   :  { %v1196_v2 = vpop.f32.mrb[12].mxu0  ;;  %v1237_v3 = vpop.f32.mrb[12].mxu1 }
 0x20f   :  { %v1197_v4 = vadd.f32 %v1196_v2, %v247_v61  ;;  %v1238_v5 = vadd.f32 %v1237_v3, %v255_v62  ;;  %v1198_v6 = vpop.f32.mrb[13].mxu0  ;;  %v1239_v7 = vpop.f32.mrb[13].mxu1 }
 0x210   :  { %v1199_v8 = vadd.f32 %v1198_v6, %v251_v63  ;;  %v1240_v9 = vadd.f32 %v1239_v7, %v259_v1  ;;  %v1200_v10 = vpop.f32.mrb[14].mxu0  ;;  %v1241_v11 = vpop.f32.mrb[14].mxu1 }
 0x211   :  { %v1256_v53 = vmul.f32 0.2, %v1197_v4  ;;  %v1258_v13 = vmul.f32 0.2, %v1238_v5  ;;  %v1201_v14 = vpop.f32.mrb[15].mxu0  ;;  %v1242_v54 = vpop.f32.mrb[15].mxu1 }
 0x212   :  { %v1257_v15 = vmul.f32 0.2, %v1199_v8  ;;  %v1259_v23 = vmul.f32 0.2, %v1240_v9 }
 0x213   :  { %v1272_v55 = vmax.f32 %v1197_v4, %v1256_v53  ;;  %v1274_v24 = vmax.f32 %v1238_v5, %v1258_v13 }
 0x214   :  { %v1273_v16 = vmax.f32 %v1199_v8, %v1257_v15  ;;  %v1275_v56 = vmax.f32 %v1240_v9, %v1259_v23 }
 0x216   :  { %v1560_v19 = vpack.c.bf16 %v1273_v16, %v1272_v55  ;;  %v1561_v22 = vpack.c.bf16 %v1275_v56, %v1274_v24 }
 0x218   :  { %v1381_v25 = vrot.slane %v1560_v19, %v1768_v47  ;;  %v1388_v26 = vrot.slane %v1561_v22, %v1768_v47 }
 0x21a   :  { %v1390_v27 = vcombine.low %v1381_v25, %v1388_v26 }
 0x21c   :  { %v1404_v29 = vrot.slane %v1390_v27, %v1768_v47 }
 0x21e   :  { %v1405_v30 = vcombine.low %v1397_v28, %v1404_v29 }
 0x220   :  { %1409 = vst [vmem:[#allocation8 + $0x8] sm:$0xff] %v1405_v30 }
 0x221   :  { %1649 = shalt.err (!%p1646_p0)
}
 0x222   :  { %s1650_s25 = scalar_lea.hbm %s1825_s3, 256 }
 0x223   :  { %p1651_p1 = scmp.ne.s32.totalorder %s1825_s3, %s1650_s25  ;;  %p1654_p2 = scmp.lt.u32.totalorder %s1650_s25, %s1825_s3 }
 0x225   :  { %p1656_p3 = pnand %p1654_p2, %p1651_p1 }
 0x227   :  { %1659 = shalt.err (!%p1656_p3)
}
 0x228   :  { %1419 = dma.vmem_to_hbm [thread:$0]  %s1417_s21, 256, %s1825_s3, [#allocation4]  }
 0x229   :  { %1664 = dma.done.wait [#allocation4], 256  }
 0x22a   :  { %1665 = vsyncadd [#allocation4], 4294967040 }
 0x22b   :  { %1423 = vsyncpa [#allocation3], 1 }
 0x22c   :  { %1424 = vsyncpa [#allocation6], 1 }
 0x22d   :  { %1425 = vsyncpa [#allocation4], 1 }

</bundles_post_ra>
